<compile_context>
chip_gen: v7x
topology: tpu7x:2x2x1
jax: 0.10.0
libtpu: 0.0.40
codegen_flags: <defaults>
</compile_context>

<pallas_src>
import numpy as np
import jax
import jax.numpy as jnp
from jax.experimental import pallas as pl
from jax.experimental.pallas import tpu as pltpu


def _round_up(a, b):
    return -(-a // b) * b


def _conv_mean_pool_kernel(x_ref, w_ref, b_ref, o_ref):
    """One block of Fb frames per grid step.

    x_ref: (Fb, HH+1, WW+1, 4*Cin)  phase-packed, halo-padded frames (bf16 or f32)
    w_ref: (4, 4*Cin, Cout)         f32 fused conv+pool weights, one (pa, qa) group per g
    b_ref: (1, Cout)                f32 bias
    o_ref: (Fb, HH, WW, Cout)       f32 pooled conv output
    """
    Fb, HHp1, WWp1, K = x_ref.shape
    HH, WW = HHp1 - 1, WWp1 - 1
    Cout = o_ref.shape[-1]

    # Single upcast: bf16 DMA, f32 compute (layout-safe slices, no cast-back on the VPU).
    x = x_ref[...].astype(jnp.float32)

    acc = None
    for g in range(4):                       # static unroll: 4 MXU dots, K = 4*Cin each
        pa, qa = g // 2, g % 2
        lhs = x[:, pa:pa + HH, qa:qa + WW, :].reshape(Fb * HH * WW, K)
        p = jnp.dot(lhs, w_ref[g], preferred_element_type=jnp.float32)
        p = p.reshape(Fb, HH, WW, Cout)
        acc = p if acc is None else acc + p

    o_ref[...] = (acc + b_ref[...]).astype(o_ref.dtype)


def conv_mean_pool(x_ncdhw, weight, bias, *, frames_per_block=None,
                   compute_dtype=jnp.bfloat16):
    """Forward of the PyTorch conv_mean_pool module.

    x_ncdhw: (N, Cin, D, H, W); weight: (Cout, Cin, 1, 3, 3) torch layout; bias: (Cout,).
    Returns (N, Cout, D, H//2, W//2) float32.
    """
    N, Cin, D, H, W = x_ncdhw.shape
    Cout = weight.shape[0]
    assert H % 2 == 0 and W % 2 == 0, "spatial dims must be even for the (1,2,2) pool"
    HH, WW = H // 2, W // 2
    F = N * D

    # ---- frames per grid step: VMEM-budget driven, even grid-block count (dual-TC v7x) ----
    in_bytes = jnp.dtype(compute_dtype).itemsize
    per_frame = (
        2 * (HH + 1) * _round_up(WW + 1, 16) * _round_up(4 * Cin, 128) * in_bytes  # 2x-buffered input
        + (HH + 1) * _round_up(WW + 1, 8) * _round_up(4 * Cin, 128) * 4            # in-kernel f32 staging
        + 2 * HH * _round_up(WW, 8) * _round_up(Cout, 128) * 4                     # 2x-buffered output
    )
    budget = 8 << 20   # ~8 MiB/grid step: safe inside the 32 MiB default scoped VMEM on v5e/v6e/v7x
    fb_cap = max(1, budget // per_frame)

    if frames_per_block is None:
        if F <= fb_cap:
            n_blocks = 2 if F >= 2 else 1      # >= 2 blocks so both v7x TensorCores get work
        else:
            n_blocks = pl.cdiv(F, fb_cap)
            n_blocks += n_blocks % 2           # keep the grid-block count even
        Fb = pl.cdiv(F, n_blocks)
    else:
        Fb = max(1, min(frames_per_block, F))
    F_pad = pl.cdiv(F, Fb) * Fb

    # ---- pack the 2x2 stride phases of the halo-padded frames into the channel dim ----
    # xp[f, i, j, (a*2+b)*Cin + c] = x_pad[f, 2i+a, 2j+b, c]
    xf = jnp.transpose(x_ncdhw, (0, 2, 3, 4, 1)).reshape(F, H, W, Cin).astype(compute_dtype)
    xf = jnp.pad(xf, ((0, F_pad - F), (1, 1), (1, 1), (0, 0)))
    xp = xf.reshape(F_pad, HH + 1, 2, WW + 1, 2, Cin)
    xp = jnp.transpose(xp, (0, 1, 3, 2, 4, 5)).reshape(F_pad, HH + 1, WW + 1, 4 * Cin)

    # ---- fuse conv + mean-pool into an effective 4x4/stride-2 kernel, split into the
    #      four (pa, qa) accumulation groups the kernel iterates over ----
    w3 = jnp.transpose(weight[:, :, 0, :, :], (2, 3, 1, 0)).astype(jnp.float32)    # (3,3,Cin,Cout)
    w_eff = 0.25 * (jnp.pad(w3, ((0, 1), (0, 1), (0, 0), (0, 0)))
                    + jnp.pad(w3, ((1, 0), (0, 1), (0, 0), (0, 0)))
                    + jnp.pad(w3, ((0, 1), (1, 0), (0, 0), (0, 0)))
                    + jnp.pad(w3, ((1, 0), (1, 0), (0, 0), (0, 0))))               # (4,4,Cin,Cout)
    w_groups = jnp.stack([
        w_eff[0:2, 0:2].reshape(4 * Cin, Cout),    # (pa, qa) = (0, 0)
        w_eff[0:2, 2:4].reshape(4 * Cin, Cout),    # (0, 1)
        w_eff[2:4, 0:2].reshape(4 * Cin, Cout),    # (1, 0)
        w_eff[2:4, 2:4].reshape(4 * Cin, Cout),    # (1, 1)
    ], axis=0)                                                                      # (4, 4*Cin, Cout)
    bk = bias.reshape(1, Cout).astype(jnp.float32)

    out = pl.pallas_call(
        _conv_mean_pool_kernel,
        out_shape=jax.ShapeDtypeStruct((F_pad, HH, WW, Cout), jnp.float32),
        grid=(F_pad // Fb,),
        in_specs=[
            pl.BlockSpec((Fb, HH + 1, WW + 1, 4 * Cin), lambda f: (f, 0, 0, 0)),
            pl.BlockSpec((4, 4 * Cin, Cout), lambda f: (0, 0, 0)),
            pl.BlockSpec((1, Cout), lambda f: (0, 0)),
        ],
        out_specs=pl.BlockSpec((Fb, HH, WW, Cout), lambda f: (f, 0, 0, 0)),
        compiler_params=pltpu.CompilerParams(dimension_semantics=("parallel",)),
    )(xp, w_groups, bk)

    # (F_pad, HH, WW, Cout) -> (N, Cout, D, HH, WW)
    out = out[:F].reshape(N, D, HH, WW, Cout)
    return jnp.transpose(out, (0, 4, 1, 2, 3))


if __name__ == "__main__":
    key = jax.random.PRNGKey(0)
    k1, k2, k3 = jax.random.split(key, 3)

    # Small shapes consistent with the module: video-like NCDHW input.
    N, Cin, Cout, D, H, W = 2, 4, 8, 3, 16, 16
    x = jax.random.normal(k1, (N, Cin, D, H, W), dtype=jnp.float32)
    weight = jax.random.normal(k2, (Cout, Cin, 1, 3, 3), dtype=jnp.float32) * 0.1
    bias = jax.random.normal(k3, (Cout,), dtype=jnp.float32) * 0.1

    out = conv_mean_pool(x, weight, bias)
    out = jax.block_until_ready(out)

    # Pure-JAX f32 reference (matches torch Conv3d + AvgPool3d semantics).
    ref = jax.lax.conv_general_dilated(
        x, weight, window_strides=(1, 1, 1),
        padding=((0, 0), (1, 1), (1, 1)),
        dimension_numbers=("NCDHW", "OIDHW", "NCDHW"))
    ref = ref + bias.reshape(1, Cout, 1, 1, 1)
    ref = ref.reshape(N, Cout, D, H // 2, 2, W // 2, 2).mean(axis=(4, 6))

    # bf16 activation DMA with f32 accumulation -> bf16-level tolerance.
    np.testing.assert_allclose(np.asarray(out), np.asarray(ref), rtol=2e-2, atol=2e-2)
    print("KERNEL_OK")
</pallas_src>

<mosaic_0001>
module attributes {stable_mosaic.version = 11 : i64} {
  func.func @_conv_mean_pool_kernel(%arg0: i32, %arg1: memref<3x9x9x16xbf16, #tpu.memory_space<vmem>>, %arg2: memref<4x16x8xf32, #tpu.memory_space<vmem>>, %arg3: memref<1x8xf32, #tpu.memory_space<vmem>>, %arg4: memref<3x8x8x8xf32, #tpu.memory_space<vmem>>) attributes {dimension_semantics = [#tpu.dimension_semantics<parallel>], iteration_bounds = array<i64: 2>, scalar_prefetch = 0 : i64, scratch_operands = 0 : i64, tpu.core_type = #tpu.core_type<tc>, window_params = [{transform_indices = @transform_0, window_bounds = array<i64: 3, 9, 9, 16>}, {pipeline_mode = #tpu.pipeline_mode<synchronous>, transform_indices = @transform_1, window_bounds = array<i64: 4, 16, 8>}, {pipeline_mode = #tpu.pipeline_mode<synchronous>, transform_indices = @transform_2, window_bounds = array<i64: 1, 8>}, {transform_indices = @transform_3, window_bounds = array<i64: 3, 8, 8, 8>}]} {
    %c0 = arith.constant 0 : index
    %c0_0 = arith.constant 0 : index
    %c0_1 = arith.constant 0 : index
    %c0_2 = arith.constant 0 : index
    %0 = vector.load %arg1[%c0, %c0_0, %c0_1, %c0_2] : memref<3x9x9x16xbf16, #tpu.memory_space<vmem>>, vector<3x9x9x16xbf16>
    %1 = arith.extf %0 : vector<3x9x9x16xbf16> to vector<3x9x9x16xf32>
    %2 = vector.extract_strided_slice %1 {offsets = [0, 0, 0, 0], sizes = [3, 8, 8, 16], strides = [1, 1, 1, 1]} : vector<3x9x9x16xf32> to vector<3x8x8x16xf32>
    %3 = vector.shape_cast %2 : vector<3x8x8x16xf32> to vector<192x16xf32>
    %c0_3 = arith.constant 0 : index
    %c0_4 = arith.constant 0 : index
    %c0_5 = arith.constant 0 : index
    %4 = vector.load %arg2[%c0_3, %c0_4, %c0_5] : memref<4x16x8xf32, #tpu.memory_space<vmem>>, vector<1x16x8xf32>
    %5 = vector.shape_cast %4 : vector<1x16x8xf32> to vector<16x8xf32>
    %cst = arith.constant dense<0.000000e+00> : vector<192x8xf32>
    %6 = tpu.matmul %3, %5, %cst {dimension_numbers = #tpu.dot_dimension_numbers<[1], [0], [0], [1], [0, 0, 1, 1], [], []>} : vector<192x16xf32>, vector<16x8xf32>, vector<192x8xf32> -> vector<192x8xf32>
    %7 = vector.shape_cast %6 : vector<192x8xf32> to vector<3x8x8x8xf32>
    %8 = vector.extract_strided_slice %1 {offsets = [0, 0, 1, 0], sizes = [3, 8, 8, 16], strides = [1, 1, 1, 1]} : vector<3x9x9x16xf32> to vector<3x8x8x16xf32>
    %9 = vector.shape_cast %8 : vector<3x8x8x16xf32> to vector<192x16xf32>
    %c1 = arith.constant 1 : index
    %c0_6 = arith.constant 0 : index
    %c0_7 = arith.constant 0 : index
    %10 = vector.load %arg2[%c1, %c0_6, %c0_7] : memref<4x16x8xf32, #tpu.memory_space<vmem>>, vector<1x16x8xf32>
    %11 = vector.shape_cast %10 : vector<1x16x8xf32> to vector<16x8xf32>
    %cst_8 = arith.constant dense<0.000000e+00> : vector<192x8xf32>
    %12 = tpu.matmul %9, %11, %cst_8 {dimension_numbers = #tpu.dot_dimension_numbers<[1], [0], [0], [1], [0, 0, 1, 1], [], []>} : vector<192x16xf32>, vector<16x8xf32>, vector<192x8xf32> -> vector<192x8xf32>
    %13 = vector.shape_cast %12 : vector<192x8xf32> to vector<3x8x8x8xf32>
    %14 = arith.addf %7, %13 : vector<3x8x8x8xf32>
    %15 = vector.extract_strided_slice %1 {offsets = [0, 1, 0, 0], sizes = [3, 8, 8, 16], strides = [1, 1, 1, 1]} : vector<3x9x9x16xf32> to vector<3x8x8x16xf32>
    %16 = vector.shape_cast %15 : vector<3x8x8x16xf32> to vector<192x16xf32>
    %c2 = arith.constant 2 : index
    %c0_9 = arith.constant 0 : index
    %c0_10 = arith.constant 0 : index
    %17 = vector.load %arg2[%c2, %c0_9, %c0_10] : memref<4x16x8xf32, #tpu.memory_space<vmem>>, vector<1x16x8xf32>
    %18 = vector.shape_cast %17 : vector<1x16x8xf32> to vector<16x8xf32>
    %cst_11 = arith.constant dense<0.000000e+00> : vector<192x8xf32>
    %19 = tpu.matmul %16, %18, %cst_11 {dimension_numbers = #tpu.dot_dimension_numbers<[1], [0], [0], [1], [0, 0, 1, 1], [], []>} : vector<192x16xf32>, vector<16x8xf32>, vector<192x8xf32> -> vector<192x8xf32>
    %20 = vector.shape_cast %19 : vector<192x8xf32> to vector<3x8x8x8xf32>
    %21 = arith.addf %14, %20 : vector<3x8x8x8xf32>
    %22 = vector.extract_strided_slice %1 {offsets = [0, 1, 1, 0], sizes = [3, 8, 8, 16], strides = [1, 1, 1, 1]} : vector<3x9x9x16xf32> to vector<3x8x8x16xf32>
    %23 = vector.shape_cast %22 : vector<3x8x8x16xf32> to vector<192x16xf32>
    %c3 = arith.constant 3 : index
    %c0_12 = arith.constant 0 : index
    %c0_13 = arith.constant 0 : index
    %24 = vector.load %arg2[%c3, %c0_12, %c0_13] : memref<4x16x8xf32, #tpu.memory_space<vmem>>, vector<1x16x8xf32>
    %25 = vector.shape_cast %24 : vector<1x16x8xf32> to vector<16x8xf32>
    %cst_14 = arith.constant dense<0.000000e+00> : vector<192x8xf32>
    %26 = tpu.matmul %23, %25, %cst_14 {dimension_numbers = #tpu.dot_dimension_numbers<[1], [0], [0], [1], [0, 0, 1, 1], [], []>} : vector<192x16xf32>, vector<16x8xf32>, vector<192x8xf32> -> vector<192x8xf32>
    %27 = vector.shape_cast %26 : vector<192x8xf32> to vector<3x8x8x8xf32>
    %28 = arith.addf %21, %27 : vector<3x8x8x8xf32>
    %c0_15 = arith.constant 0 : index
    %c0_16 = arith.constant 0 : index
    %29 = vector.load %arg3[%c0_15, %c0_16] : memref<1x8xf32, #tpu.memory_space<vmem>>, vector<1x8xf32>
    %30 = vector.shape_cast %29 : vector<1x8xf32> to vector<1x1x1x8xf32>
    %31 = vector.broadcast %30 : vector<1x1x1x8xf32> to vector<3x8x8x8xf32>
    %32 = arith.addf %28, %31 : vector<3x8x8x8xf32>
    %c0_17 = arith.constant 0 : index
    %c0_18 = arith.constant 0 : index
    %c0_19 = arith.constant 0 : index
    %c0_20 = arith.constant 0 : index
    %33 = vector.load %arg4[%c0_17, %c0_18, %c0_19, %c0_20] : memref<3x8x8x8xf32, #tpu.memory_space<vmem>>, vector<3x8x8x8xf32>
    tpu.vector_store %arg4[%c0_17, %c0_18, %c0_19, %c0_20], %32 {strides = array<i32>} : memref<3x8x8x8xf32, #tpu.memory_space<vmem>>, vector<3x8x8x8xf32>,
    return
  }
  func.func @transform_0(%arg0: i32) -> (i32, i32, i32, i32) {
    %c0_i32 = arith.constant 0 : i32
    %c0_i32_0 = arith.constant 0 : i32
    %c0_i32_1 = arith.constant 0 : i32
    %c0_i32_2 = arith.constant 0 : i32
    return %arg0, %c0_i32, %c0_i32_0, %c0_i32_1 : i32, i32, i32, i32
  }
  func.func @transform_1(%arg0: i32) -> (i32, i32, i32) {
    %c0_i32 = arith.constant 0 : i32
    %c0_i32_0 = arith.constant 0 : i32
    %c0_i32_1 = arith.constant 0 : i32
    %c0_i32_2 = arith.constant 0 : i32
    return %c0_i32, %c0_i32_0, %c0_i32_1 : i32, i32, i32
  }
  func.func @transform_2(%arg0: i32) -> (i32, i32) {
    %c0_i32 = arith.constant 0 : i32
    %c0_i32_0 = arith.constant 0 : i32
    %c0_i32_1 = arith.constant 0 : i32
    return %c0_i32, %c0_i32_0 : i32, i32
  }
  func.func @transform_3(%arg0: i32) -> (i32, i32, i32, i32) {
    %c0_i32 = arith.constant 0 : i32
    %c0_i32_0 = arith.constant 0 : i32
    %c0_i32_1 = arith.constant 0 : i32
    %c0_i32_2 = arith.constant 0 : i32
    return %arg0, %c0_i32, %c0_i32_0, %c0_i32_1 : i32, i32, i32, i32
  }
}

</mosaic_0001>

<bundles_post_ra>
// kernel: tpu_custom_call.1
= control target key start
LH: loop header
LB: loop body
LE: loop exit
PB: predicated region body
PF: predicated region fallthrough
CT: control target
= control target key end

     0   :  { %8 = vsyncpa [#allocation3], 0  ;;  %s2605_s0 = inlined_call_operand.vmem [shape: bf16[6,9,9,16], index: 0, kind: input, shape index: {}]   ;;  %s2606_s1 = inlined_call_operand.vmem [shape: f32[4,16,8], index: 1, kind: input, shape index: {}]   ;;  %s2607_s2 = inlined_call_operand.vmem [shape: f32[1,8], index: 2, kind: input, shape index: {}]   ;;  %s2608_s3 = inlined_call_operand.hbm [shape: f32[6,8,8,8], index: 3, kind: output, shape index: {}]  }
   0x1   :  { %10 = vsyncpa [#allocation3 + $0x1], 0  ;;  %s2081_s12 = smov 0   ;;  %s2083_s13 = smov 0  }
   0x2   :  { %s2085_s14 = smov 0   ;;  %s2087_s15 = smov 0  }
   0x3 LB: > { %s2102_s16 = sadd.s32 4294967295, %s2056_s15   ;;  %s1484_s17 = sadd.s32 4294967294, %s2056_s15   ;;  %s2056_s15 = sphi %s2087_s15, %s2614_s15   ;;  %s2052_s14 = sphi %s2085_s14, %s2613_s14   ;;  %s2048_s13 = sphi %s2083_s13, %s2612_s13   ;;  %s2044_s12 = sphi %s2081_s12, %s2611_s12  }
   0x4   : > { %s2106_s18 = sadd.s32 1, %s2056_s15   ;;  %s91_s19 = sadd.s32 1, %s2052_s14 }
   0x5   : > { %s88_s20 = ssub.s32 %s2056_s15, %s2106_s18  ;;  %p101_p0 = scmp.ne.s32.totalorder %s2052_s14, %s2048_s13 }
   0x6   : > { %p89_p1 = scmp.eq.s32.totalorder %s88_s20, 0  ;;  %p102_p2 = scmp.eq.s32.totalorder %s2102_s16, 1 }
   0x7   : > { %p107_p3 = scmp.ne.s32.totalorder %s2048_s13, %s2044_s12  ;;  %p108_p4 = scmp.eq.s32.totalorder %s1484_s17, 1 }
   0x8   : > { %s2117_s21 = scalar_select %p89_p1, %s2052_s14, %s91_s19  }
   0x9   : > { %p2119_p5 = por %p102_p2, %p101_p0  ;;  %p2123_p6 = por %p108_p4, %p107_p3 }
   0xa   : > { %p1487_p7 = scmp.ge.s32.totalorder %s2056_s15, 1  ;;  %p142_p8 = scmp.lt.s32.totalorder %s2056_s15, 3 }
   0xc   : > { %p143_p9 = pnand %p1487_p7, %p142_p8 }
   0xd   : > { %v283_v0 = vld [vmem:[%s2606_s1] sm:$0xff] (!%p143_p9)  ;;  %v284_v1 = vld [vmem:[%s2606_s1 + $0x8] sm:$0xff] (!%p143_p9)  ;;  %s167_s30 = smul.u32 (!%p143_p9), 3, %s2102_s16  ;;  %v1513_v5 = vld [vmem:[%s2606_s1 + $0x10] sm:$0xff] (!%p143_p9)  ;;  %vm285_vm0 = vcmask (!%p143_p9), 130048   ;;  %vm567_vm1 = vcmask (!%p143_p9), 1046528  }
   0xe   : > { %146 = sbr.rel (%p143_p9) target bundleno = 353 (0x161), region = 32  ;;  %v1539_v2 = vld [vmem:[%s2606_s1 + $0x20] sm:$0xff] (!%p143_p9)  ;;  %v1863_v3 = vpack.c.bf16 (!%p143_p9), %v284_v1, %v283_v0  ;;  %v1540_v4 = vld [vmem:[%s2606_s1 + $0x28] sm:$0xff] (!%p143_p9)  ;;  %v1514_v6 = vld [vmem:[%s2606_s1 + $0x18] sm:$0xff] (!%p143_p9)  ;;  %s164_s27 = sand.u32 (!%p143_p9), 1, %s2048_s13   ;;  %vm1382_vm2 = vcmask (!%p143_p9), 64512  }
   0xf   : > { %v1871_v7 = vpack.c.bf16 (!%p143_p9), %v1540_v4, %v1539_v2  ;;  %p168_p10 = scmp.lt.s32.totalorder (!%p143_p9), %s167_s30, 5  ;;  %v1867_v8 = vpack.c.bf16 (!%p143_p9), %v1514_v6, %v1513_v5  ;;  %v1565_v9 = vld [vmem:[%s2606_s1 + $0x30] sm:$0xff] (!%p143_p9)  ;;  %v1566_v10 = vld [vmem:[%s2606_s1 + $0x38] sm:$0xff] (!%p143_p9)  ;;  %s1951_s28 = smul.u32 (!%p143_p9), 192, %s164_s27 }
  0x10   : > { %1864 = vmatprep.subr.bf16.mxu1 (!%p143_p9), %v1863_v3  ;;  %v1875_v11 = vpack.c.bf16 (!%p143_p9), %v1566_v10, %v1565_v9  ;;  %s1598_s5 = smul.u32 (!%p143_p9), 3072, %s2102_s16  ;;  %s2564_s9 = scalar_lea.sflag (!%p143_p9), [#allocation3], %s164_s27 }
  0x11   : > { %1872 = vmatprep.subr.bf16.mxu0 (!%p143_p9), %v1871_v7  ;;  %1866 = vmatpush3.bf16.msra.mxu1 (!%p143_p9), %v1863_v3  ;;  %s2481_s4 = scalar_lea.vmem (!%p143_p9), [#allocation2], %s1951_s28  ;;  %s2058_s11 = smov (!%p143_p9), [#allocation2]  }
  0x12   : > { %1874 = vmatpush3.bf16.msra.mxu0 (!%p143_p9), %v1871_v7  ;;  %1868 = vmatprep.subr.bf16.mxu1 (!%p143_p9), %v1867_v8  ;;  %s1422_s6 = sshll.u32 (!%p143_p9), %s2481_s4, 4  ;;  %s2553_s8 = scalar_lea.hbm (!%p143_p9), %s2608_s3, %s1598_s5  ;;  %s2555_s6 = int_to_ptr.vmem [resolvable:$true] %s1422_s6 }
  0x13   : > { %1876 = vmatprep.subr.bf16.mxu0 (!%p143_p9), %v1875_v11  ;;  %s1994_s10 = scalar_lea.vmem (!%p143_p9), %s2555_s6, 3072  ;;  %s1998_s17 = sshll.u32 (!%p143_p9), %s2058_s11, 4  ;;  %s1999_s17 = int_to_ptr.vmem [resolvable:$false] %s1998_s17 }
  0x14   : > { %p1995_p11 = scmp.ne.s32.totalorder (!%p143_p9), %s2555_s6, %s1994_s10  ;;  %s2000_s19 = scalar_lea.vmem (!%p143_p9), %s1999_s17, 6144 }
  0x15   : > { %s2616_s30 = smov (!%p168_p10, %s167_s30), 5  ;;  %p2001_p0 = scmp.lt.s32.totalorder %s2555_s6, %s1999_s17 }
  0x16   : > { %s1952_s20 = smul.u32 72, %s2616_s30  ;;  %p1996_p12 = pnand %p1995_p11, %p2119_p5 }
  0x17   : > { %p2002_p1 = scmp.lt.s32.totalorder %s2000_s19, %s1994_s10 }
  0x18   : > { %s2157_s26 = scalar_lea.vmem %s2605_s0, %s1952_s20  ;;  %p1997_p13 = pneg %p1996_p12 }
  0x19   : > { %v2160_v12 = vld [vmem:[%s2157_s26] ss:$8 sps:$4 sm:$0xff]   ;;  %v179_v13 = vld [vmem:[%s2157_s26 + $0x10] ss:$8 sps:$4 sm:$0xff]   ;;  %v176_v46 = vld [vmem:[%s2157_s26 + $0x4] sm:$0x1]  ;;  %p2003_p2 = por %p2002_p1, %p2001_p0 }
  0x1a   : > { %v229_v14 = vunpack.c.l.bf16 %v2160_v12  ;;  %v2165_v15 = vunpack.c.h.bf16 %v2160_v12  ;;  %v2167_v16 = vunpack.c.l.bf16 %v179_v13  ;;  %v183_v17 = vld [vmem:[%s2157_s26 + $0x20] ss:$8 sps:$4 sm:$0xff]   ;;  %v2170_v18 = vunpack.c.h.bf16 %v179_v13  ;;  %v187_v21 = vld [vmem:[%s2157_s26 + $0x30] ss:$8 sps:$4 sm:$0xff]   ;;  %v178_v47 = vld [vmem:[%s2157_s26 + $0xc] sm:$0x1] }
  0x1b   : > { %v2181_v19 = vunpack.c.l.bf16 %v183_v17  ;;  %v2183_v20 = vunpack.c.h.bf16 %v183_v17  ;;  %v2194_v22 = vunpack.c.l.bf16 %v187_v21  ;;  %v2200_v23 = vunpack.c.h.bf16 %v187_v21  ;;  %v2203_v24 = vld [vmem:[%s2157_s26 + $0x40] ss:$8 sps:$4 sm:$0xff]   ;;  %v195_v25 = vld [vmem:[%s2157_s26 + $0x50] ss:$8 sps:$4 sm:$0xff]   ;;  %v180_v53 = vld [vmem:[%s2157_s26 + $0x14] sm:$0x1]  ;;  %p2004_p3 = pnand %p2003_p2, %p1997_p13 }
  0x1c   : > { %1707 = vmatprep.mubr.msk.f32.mxu1 %vm285_vm0, %v229_v14  ;;  %1787 = vmatprep.mubr.msk.f32.mxu0 %vm285_vm0, %v2165_v15  ;;  %v245_v26 = vunpack.c.l.bf16 %v2203_v24  ;;  %v247_v27 = vunpack.c.h.bf16 %v2203_v24  ;;  %v2216_v28 = vunpack.c.l.bf16 %v195_v25  ;;  %v199_v29 = vld [vmem:[%s2157_s26 + $0x60] ss:$8 sps:$4 sm:$0xff]   ;;  %v2224_v30 = vunpack.c.h.bf16 %v195_v25  ;;  %v203_v32 = vld [vmem:[%s2157_s26 + $0x70] ss:$8 sps:$4 sm:$0xff]   ;;  %v182_v54 = vld [vmem:[%s2157_s26 + $0x1c] sm:$0x1] }
  0x1d   : > { %1708 = vmatmul.mubr.msk.f32.vlgmr.msra.gmra.mrb[0].mxu1 %vm285_vm0, %v2165_v15  ;;  %1788 = vmatmul.mubr.msk.f32.vlgmr.msra.gmra.mrb[0].mxu0 %vm285_vm0, %v2167_v16  ;;  %v2231_v31 = vunpack.c.l.bf16 %v199_v29  ;;  %v2238_v33 = vunpack.c.h.bf16 %v199_v29  ;;  %v2244_v34 = vunpack.c.l.bf16 %v203_v32  ;;  %v2247_v35 = vld [vmem:[%s2157_s26 + $0x80] ss:$8 sps:$4 sm:$0xff]   ;;  %v2253_v36 = vunpack.c.h.bf16 %v203_v32  ;;  %v2263_v38 = vld [vmem:[%s2157_s26 + $0x90] ss:$8 sps:$4 sm:$0xff]   ;;  %v184_v60 = vld [vmem:[%s2157_s26 + $0x24] sm:$0x1] }
  0x1e   : > { %1870 = vmatpush3.bf16.msra.mxu1 %v1867_v8  ;;  %1878 = vmatpush3.bf16.msra.mxu0 %v1875_v11  ;;  %v2260_v37 = vunpack.c.l.bf16 %v2247_v35  ;;  %v263_v39 = vunpack.c.h.bf16 %v2247_v35  ;;  %v265_v40 = vunpack.c.l.bf16 %v2263_v38  ;;  %v2276_v41 = vunpack.c.h.bf16 %v2263_v38  ;;  %v215_v42 = vld [vmem:[%s2157_s26 + $0xa0] ss:$8 sps:$4 sm:$0xff]   ;;  %v219_v45 = vld [vmem:[%s2157_s26 + $0xb0] ss:$8 sps:$4 sm:$0xff]   ;;  %v186_v1 = vld [vmem:[%s2157_s26 + $0x2c] sm:$0x1] }
  0x1f   : > { %1710 = vmatprep.mubr.msk.f32.mxu1 %vm285_vm0, %v2167_v16  ;;  %1790 = vmatprep.mubr.msk.f32.mxu0 %vm285_vm0, %v2170_v18  ;;  %v2284_v43 = vunpack.c.l.bf16 %v215_v42  ;;  %v2291_v44 = vunpack.c.h.bf16 %v215_v42  ;;  %v2300_v48 = vunpack.c.l.bf16 %v219_v45  ;;  %v2306_v49 = vunpack.c.h.bf16 %v219_v45  ;;  %v223_v50 = vld [vmem:[%s2157_s26 + $0xc0] ss:$8 sps:$4 sm:$0xff]   ;;  %v2326_v58 = vld [vmem:[%s2157_s26 + $0xd0] sm:$0xf]  ;;  %v188_v11 = vld [vmem:[%s2157_s26 + $0x34] sm:$0x1] }
  0x20   : > { %v230_v51 = vunpack.c.l.bf16 %v176_v46  ;;  %v232_v52 = vunpack.c.l.bf16 %v178_v47  ;;  %v2315_v55 = vunpack.c.l.bf16 %v223_v50  ;;  %v568_v56 = vrot.slane %v229_v14, 1  ;;  %v190_v12 = vld [vmem:[%s2157_s26 + $0x3c] sm:$0x1]  ;;  %v192_v29 = vld [vmem:[%s2157_s26 + $0x44] sm:$0x1] }
  0x21   : > { %1711 = vmatmul.mubr.msk.f32.gmra.mrb[2].mxu1 %vm285_vm0, %v2170_v18  ;;  %1791 = vmatmul.mubr.msk.f32.gmra.mrb[2].mxu0 %vm285_vm0, %v2181_v19  ;;  %v2323_v57 = vunpack.c.h.bf16 %v223_v50  ;;  %v234_v59 = vunpack.c.l.bf16 %v180_v53  ;;  %v571_v62 = vrot.slane %v2165_v15, 1  ;;  %v236_v0 = vunpack.c.l.bf16 %v182_v54  ;;  %v194_v32 = vld [vmem:[%s2157_s26 + $0x4c] sm:$0x1]  ;;  %v196_v42 = vld [vmem:[%s2157_s26 + $0x54] sm:$0x1] }
  0x22   : > { %1713 = vmatprep.mubr.msk.f32.mxu1 %vm285_vm0, %v2181_v19  ;;  %1793 = vmatprep.mubr.msk.f32.mxu0 %vm285_vm0, %v2183_v20  ;;  %v569_v61 = vrot.slane %v230_v51, 1  ;;  %v572_v63 = vrot.slane %v232_v52, 1  ;;  %v281_v2 = vunpack.c.l.bf16 %v2326_v58  ;;  %v238_v3 = vunpack.c.l.bf16 %v184_v60  ;;  %v198_v54 = vld [vmem:[%s2157_s26 + $0x5c] sm:$0x1]  ;;  %v204_v24 = vld [vmem:[%s2157_s26 + $0x74] sm:$0x1] }
  0x23   : > { %v574_v4 = vrot.slane %v2167_v16, 1  ;;  %v575_v5 = vrot.slane %v234_v59, 1  ;;  %v240_v6 = vunpack.c.l.bf16 %v186_v1  ;;  %v577_v9 = vrot.slane %v2170_v18, 1  ;;  %v220_v35 = vld [vmem:[%s2157_s26 + $0xb4] sm:$0x1] }
  0x24   : > { %v570_v7 = vsel %vm567_vm1, %v568_v56, %v569_v61  ;;  %v573_v8 = vsel %vm567_vm1, %v571_v62, %v572_v63  ;;  %v578_v10 = vrot.slane %v236_v0, 1  ;;  %v580_v13 = vrot.slane %v2181_v19, 1  ;;  %v200_v56 = vld [vmem:[%s2157_s26 + $0x64] sm:$0x1] }
  0x25   : > { %1714 = vmatmul.mubr.msk.f32.gmra.mrb[4].mxu1 %vm285_vm0, %v2183_v20  ;;  %1794 = vmatmul.mubr.msk.f32.gmra.mrb[4].mxu0 %vm285_vm0, %v2194_v22  ;;  %v581_v14 = vrot.slane %v238_v3, 1  ;;  %v576_v15 = vsel %vm567_vm1, %v574_v4, %v575_v5  ;;  %v583_v16 = vrot.slane %v2183_v20, 1  ;;  %v584_v17 = vrot.slane %v240_v6, 1 }
  0x26   : > { %1716 = vmatprep.mubr.msk.f32.mxu1 %vm285_vm0, %v2194_v22  ;;  %1796 = vmatprep.mubr.msk.f32.mxu0 %vm285_vm0, %v2200_v23  ;;  %v242_v18 = vunpack.c.l.bf16 %v188_v11  ;;  %v579_v21 = vsel %vm567_vm1, %v577_v9, %v578_v10  ;;  %v244_v25 = vunpack.c.l.bf16 %v190_v12  ;;  %v586_v45 = vrot.slane %v2194_v22, 1  ;;  %v206_v11 = vld [vmem:[%s2157_s26 + $0x7c] sm:$0x1] }
  0x27   : > { %v582_v19 = vsel %vm567_vm1, %v580_v13, %v581_v14  ;;  %v585_v20 = vsel %vm567_vm1, %v583_v16, %v584_v17  ;;  %v246_v47 = vunpack.c.l.bf16 %v192_v29  ;;  %v589_v50 = vrot.slane %v2200_v23, 1  ;;  %v214_v29 = vld [vmem:[%s2157_s26 + $0x9c] sm:$0x1] }
  0x28   : > { %v587_v46 = vrot.slane %v242_v18, 1  ;;  %v590_v51 = vrot.slane %v244_v25, 1  ;;  %v248_v52 = vunpack.c.l.bf16 %v194_v32  ;;  %v250_v53 = vunpack.c.l.bf16 %v196_v42  ;;  %v212_v25 = vld [vmem:[%s2157_s26 + $0x94] sm:$0x1] }
  0x29   : > { %1717 = vmatmul.mubr.msk.f32.gmra.mrb[6].mxu1 %vm285_vm0, %v2200_v23  ;;  %1797 = vmatmul.mubr.msk.f32.gmra.mrb[6].mxu0 %vm285_vm0, %v245_v26  ;;  %v1124_v59 = vrot.slane %v245_v26, 1  ;;  %v592_v22 = vrot.slane %v247_v27, 1  ;;  %v1125_v60 = vrot.slane %v246_v47, 1  ;;  %v595_v61 = vrot.slane %v2216_v28, 1  ;;  %v202_v26 = vld [vmem:[%s2157_s26 + $0x6c] sm:$0x1] }
  0x2a   : > { %1719 = vmatprep.mubr.msk.f32.mxu1 %vm285_vm0, %v247_v27  ;;  %1799 = vmatprep.mubr.msk.f32.mxu0 %vm285_vm0, %v2216_v28  ;;  %v588_v23 = vsel %vm567_vm1, %v586_v45, %v587_v46  ;;  %v252_v62 = vunpack.c.l.bf16 %v198_v54  ;;  %v591_v63 = vsel %vm567_vm1, %v589_v50, %v590_v51  ;;  %v593_v0 = vrot.slane %v248_v52, 1  ;;  %v216_v50 = vld [vmem:[%s2157_s26 + $0xa4] sm:$0x1]  ;;  %v218_v51 = vld [vmem:[%s2157_s26 + $0xac] sm:$0x1] }
  0x2b   : > { %v596_v1 = vrot.slane %v250_v53, 1  ;;  %v254_v3 = vunpack.c.l.bf16 %v200_v56  ;;  %v598_v27 = vrot.slane %v2224_v30, 1  ;;  %v601_v5 = vrot.slane %v2231_v31, 1 }
  0x2c   : > { %v599_v4 = vrot.slane %v252_v62, 1  ;;  %v256_v6 = vunpack.c.l.bf16 %v202_v26  ;;  %v258_v10 = vunpack.c.l.bf16 %v204_v24  ;;  %v604_v12 = vrot.slane %v2238_v33, 1  ;;  %v224_v26 = vld [vmem:[%s2157_s26 + $0xc4] sm:$0x1]  ;;  %v226_v24 = vld [vmem:[%s2157_s26 + $0xcc] sm:$0x1] }
  0x2d   : > { %1720 = vmatmul.mubr.msk.f32.gmra.mrb[8].mxu1 %vm285_vm0, %v2216_v28  ;;  %1800 = vmatmul.mubr.msk.f32.gmra.mrb[8].mxu0 %vm285_vm0, %v2224_v30  ;;  %v1126_v28 = vsel %vm567_vm1, %v1124_v59, %v1125_v60  ;;  %v602_v9 = vrot.slane %v254_v3, 1  ;;  %v260_v14 = vunpack.c.l.bf16 %v206_v11  ;;  %v607_v17 = vrot.slane %v2244_v34, 1 }
  0x2e   : > { %1722 = vmatprep.mubr.msk.f32.mxu1 %vm285_vm0, %v2224_v30  ;;  %1802 = vmatprep.mubr.msk.f32.mxu0 %vm285_vm0, %v2231_v31  ;;  %v208_v30 = vld [vmem:[%s2157_s26 + $0x84] sm:$0x1]  ;;  %v605_v13 = vrot.slane %v256_v6, 1  ;;  %v608_v18 = vrot.slane %v258_v10, 1  ;;  %v610_v42 = vrot.slane %v2253_v36, 1  ;;  %v613_v45 = vrot.slane %v2260_v37, 1 }
  0x2f   : > { %v603_v16 = vsel %vm567_vm1, %v601_v5, %v602_v9  ;;  %v268_v47 = vunpack.c.l.bf16 %v214_v29  ;;  %v1127_v52 = vrot.slane %v263_v39, 1  ;;  %v616_v53 = vrot.slane %v265_v40, 1 }
  0x30   : > { %v270_v56 = vunpack.c.l.bf16 %v216_v50  ;;  %v272_v60 = vunpack.c.l.bf16 %v218_v51  ;;  %v274_v62 = vunpack.c.l.bf16 %v220_v35  ;;  %v631_v5 = vrot.slane %v2306_v49, 1 }
  0x31   : > { %1723 = vmatmul.mubr.msk.f32.gmra.mrb[10].mxu1 %vm285_vm0, %v2231_v31  ;;  %1803 = vmatmul.mubr.msk.f32.gmra.mrb[10].mxu0 %vm285_vm0, %v2238_v33  ;;  %v600_v31 = vsel %vm567_vm1, %v598_v27, %v599_v4  ;;  %v628_v27 = vrot.slane %v2300_v48, 1  ;;  %v278_v4 = vunpack.c.l.bf16 %v224_v26 }
  0x32   : > { %1725 = vmatprep.mubr.msk.f32.mxu1 %vm285_vm0, %v2238_v33  ;;  %1805 = vmatprep.mubr.msk.f32.mxu0 %vm285_vm0, %v2244_v34  ;;  %v606_v33 = vsel %vm567_vm1, %v604_v12, %v605_v13 }
  0x33   : > { %v635_v10 = vrot.slane %v278_v4, 1 }
  0x35   : > { %1726 = vmatmul.mubr.msk.f32.gmra.mrb[12].mxu1 %vm285_vm0, %v2244_v34  ;;  %1806 = vmatmul.mubr.msk.f32.gmra.mrb[12].mxu0 %vm285_vm0, %v2253_v36  ;;  %v611_v34 = vrot.slane %v260_v14, 1 }
  0x36   : > { %1728 = vmatprep.mubr.msk.f32.mxu1 %vm285_vm0, %v2253_v36  ;;  %1808 = vmatprep.mubr.msk.f32.mxu0 %vm285_vm0, %v2260_v37 }
  0x39   : > { %1729 = vmatmul.mubr.msk.f32.gmra.mrb[14].mxu1 %vm285_vm0, %v2260_v37  ;;  %1809 = vmatmul.mubr.msk.f32.gmra.mrb[14].mxu0 %vm285_vm0, %v263_v39  ;;  %v612_v37 = vsel %vm567_vm1, %v610_v42, %v611_v34  ;;  %v222_v39 = vld [vmem:[%s2157_s26 + $0xbc] sm:$0x1] }
  0x3a   : > { %1731 = vmatprep.mubr.msk.f32.mxu1 %vm285_vm0, %v265_v40  ;;  %1811 = vmatprep.mubr.msk.f32.mxu0 %vm285_vm0, %v2276_v41  ;;  %v622_v40 = vrot.slane %v2284_v43, 1  ;;  %v276_v3 = vunpack.c.l.bf16 %v222_v39 }
  0x3c   : > { %v632_v6 = vrot.slane %v276_v3, 1 }
  0x3d   : > { %1732 = vmatmul.mubr.msk.f32.gmra.mrb[16].mxu1 %vm285_vm0, %v2276_v41  ;;  %1812 = vmatmul.mubr.msk.f32.gmra.mrb[16].mxu0 %vm285_vm0, %v2284_v43 }
  0x3e   : > { %1734 = vmatprep.mubr.msk.f32.mxu1 %vm285_vm0, %v2284_v43  ;;  %1814 = vmatprep.mubr.msk.f32.mxu0 %vm285_vm0, %v2291_v44 }
  0x41   : > { %1735 = vmatmul.mubr.msk.f32.gmra.mrb[18].mxu1 %vm285_vm0, %v2291_v44  ;;  %1815 = vmatmul.mubr.msk.f32.gmra.mrb[18].mxu0 %vm285_vm0, %v2300_v48 }
  0x42   : > { %1737 = vmatprep.mubr.msk.f32.mxu1 %vm285_vm0, %v2300_v48  ;;  %1817 = vmatprep.mubr.msk.f32.mxu0 %vm285_vm0, %v2306_v49  ;;  %v634_v48 = vrot.slane %v2315_v55, 1 }
  0x44   : > { %v636_v12 = vsel %vm567_vm1, %v634_v48, %v635_v10 }
  0x45   : > { %1738 = vmatmul.mubr.msk.f32.gmra.mrb[20].mxu1 %vm285_vm0, %v2306_v49  ;;  %1818 = vmatmul.mubr.msk.f32.gmra.mrb[20].mxu0 %vm285_vm0, %v2315_v55  ;;  %v637_v49 = vrot.slane %v2323_v57, 1 }
  0x46   : > { %1740 = vmatprep.mubr.msk.f32.mxu1 %vm285_vm0, %v2315_v55  ;;  %1820 = vmatprep.mubr.msk.f32.mxu0 %vm285_vm0, %v2323_v57  ;;  %v1130_v55 = vrot.slane %v281_v2, 1 }
  0x49   : > { %1741 = vmatmul.mubr.msk.f32.gmra.mrb[22].mxu1 %vm285_vm0, %v2323_v57  ;;  %1821 = vmatmul.mubr.msk.f32.gmra.mrb[22].mxu0 %vm285_vm0, %v281_v2 }
  0x4a   : > { %1747 = vmatprep.mubr.msk.f32.mxu1 %vm285_vm0, %v570_v7  ;;  %1827 = vmatprep.mubr.msk.f32.mxu0 %vm285_vm0, %v573_v8  ;;  %v594_v7 = vsel %vm567_vm1, %v592_v22, %v593_v0  ;;  %v619_v22 = vrot.slane %v2276_v41, 1  ;;  %v623_v41 = vrot.slane %v270_v56, 1  ;;  %v625_v0 = vrot.slane %v2291_v44, 1 }
  0x4c   : > { %v624_v43 = vsel %vm567_vm1, %v622_v40, %v623_v41 }
  0x4d   : > { %1748 = vmatmul.mubr.msk.f32.vlgmr.msra.gmra.mrb[0].mxu1 %vm285_vm0, %v573_v8  ;;  %1828 = vmatmul.mubr.msk.f32.vlgmr.msra.gmra.mrb[0].mxu0 %vm285_vm0, %v576_v15  ;;  %v597_v8 = vsel %vm567_vm1, %v595_v61, %v596_v1  ;;  %v626_v1 = vrot.slane %v272_v60, 1 }
  0x4e   : > { %1750 = vmatprep.mubr.msk.f32.mxu1 %vm285_vm0, %v576_v15  ;;  %1830 = vmatprep.mubr.msk.f32.mxu0 %vm285_vm0, %v579_v21  ;;  %v210_v15 = vld [vmem:[%s2157_s26 + $0x8c] sm:$0x1] }
  0x4f   : > { %v264_v32 = vunpack.c.l.bf16 %v210_v15  ;;  %v627_v44 = vsel %vm567_vm1, %v625_v0, %v626_v1  ;;  %v2477_v15 = vld [vmem:[%s2607_s2] ss:$0 sm:$0xff] }
  0x51   : > { %1751 = vmatmul.mubr.msk.f32.gmra.mrb[2].mxu1 %vm285_vm0, %v579_v21  ;;  %1831 = vmatmul.mubr.msk.f32.gmra.mrb[2].mxu0 %vm285_vm0, %v582_v19  ;;  %v262_v21 = vunpack.c.l.bf16 %v208_v30  ;;  %v1128_v36 = vrot.slane %v264_v32, 1  ;;  %v633_v30 = vsel %vm567_vm1, %v631_v5, %v632_v6 }
  0x52   : > { %1753 = vmatprep.mubr.msk.f32.mxu1 %vm285_vm0, %v582_v19  ;;  %1833 = vmatprep.mubr.msk.f32.mxu0 %vm285_vm0, %v585_v20  ;;  %v266_v19 = vunpack.c.l.bf16 %v212_v25 }
  0x53   : > { %v614_v46 = vrot.slane %v262_v21, 1  ;;  %v1129_v61 = vsel %vm567_vm1, %v1127_v52, %v1128_v36 }
  0x54   : > { %v617_v54 = vrot.slane %v266_v19, 1 }
  0x55   : > { %1754 = vmatmul.mubr.msk.f32.gmra.mrb[4].mxu1 %vm285_vm0, %v585_v20  ;;  %1834 = vmatmul.mubr.msk.f32.gmra.mrb[4].mxu0 %vm285_vm0, %v588_v23  ;;  %v609_v20 = vsel %vm567_vm1, %v607_v17, %v608_v18  ;;  %v615_v59 = vsel %vm567_vm1, %v613_v45, %v614_v46 }
  0x56   : > { %1756 = vmatprep.mubr.msk.f32.mxu1 %vm285_vm0, %v588_v23  ;;  %1836 = vmatprep.mubr.msk.f32.mxu0 %vm285_vm0, %v591_v63  ;;  %v620_v23 = vrot.slane %v268_v47, 1  ;;  %v618_v38 = vsel %vm567_vm1, %v616_v53, %v617_v54 }
  0x59   : > { %1757 = vmatmul.mubr.msk.f32.gmra.mrb[6].mxu1 %vm285_vm0, %v591_v63  ;;  %1837 = vmatmul.mubr.msk.f32.gmra.mrb[6].mxu0 %vm285_vm0, %v1126_v28  ;;  %v621_v63 = vsel %vm567_vm1, %v619_v22, %v620_v23  ;;  %v629_v28 = vrot.slane %v274_v62, 1 }
  0x5a   : > { %1759 = vmatprep.mubr.msk.f32.mxu1 %vm285_vm0, %v594_v7  ;;  %1839 = vmatprep.mubr.msk.f32.mxu0 %vm285_vm0, %v597_v8  ;;  %v280_v7 = vunpack.c.l.bf16 %v226_v24 }
  0x5b   : > { %v630_v9 = vsel %vm567_vm1, %v628_v27, %v629_v28 }
  0x5d   : > { %1760 = vmatmul.mubr.msk.f32.gmra.mrb[8].mxu1 %vm285_vm0, %v597_v8  ;;  %1840 = vmatmul.mubr.msk.f32.gmra.mrb[8].mxu0 %vm285_vm0, %v600_v31  ;;  %v228_v8 = vld [vmem:[%s2157_s26 + $0xd4] sm:$0x1] }
  0x5e   : > { %1762 = vmatprep.mubr.msk.f32.mxu1 %vm285_vm0, %v600_v31  ;;  %1842 = vmatprep.mubr.msk.f32.mxu0 %vm285_vm0, %v603_v16  ;;  %v282_v11 = vunpack.c.l.bf16 %v228_v8  ;;  %v638_v31 = vrot.slane %v280_v7, 1 }
  0x60   : > { %v1131_v13 = vrot.slane %v282_v11, 1  ;;  %v639_v14 = vsel %vm567_vm1, %v637_v49, %v638_v31 }
  0x61   : > { %1763 = vmatmul.mubr.msk.f32.gmra.mrb[10].mxu1 %vm285_vm0, %v603_v16  ;;  %1843 = vmatmul.mubr.msk.f32.gmra.mrb[10].mxu0 %vm285_vm0, %v606_v33 }
  0x62   : > { %1765 = vmatprep.mubr.msk.f32.mxu1 %vm285_vm0, %v606_v33  ;;  %1845 = vmatprep.mubr.msk.f32.mxu0 %vm285_vm0, %v609_v20  ;;  %v1132_v57 = vsel %vm567_vm1, %v1130_v55, %v1131_v13 }
  0x65   : > { %1766 = vmatmul.mubr.msk.f32.gmra.mrb[12].mxu1 %vm285_vm0, %v609_v20  ;;  %1846 = vmatmul.mubr.msk.f32.gmra.mrb[12].mxu0 %vm285_vm0, %v612_v37 }
  0x66   : > { %1768 = vmatprep.mubr.msk.f32.mxu1 %vm285_vm0, %v612_v37  ;;  %1848 = vmatprep.mubr.msk.f32.mxu0 %vm285_vm0, %v615_v59 }
  0x69   : > { %1769 = vmatmul.mubr.msk.f32.gmra.mrb[14].mxu1 %vm285_vm0, %v615_v59  ;;  %1849 = vmatmul.mubr.msk.f32.gmra.mrb[14].mxu0 %vm285_vm0, %v1129_v61 }
  0x6a   : > { %1771 = vmatprep.mubr.msk.f32.mxu1 %vm285_vm0, %v618_v38  ;;  %1851 = vmatprep.mubr.msk.f32.mxu0 %vm285_vm0, %v621_v63 }
  0x6d   : > { %1772 = vmatmul.mubr.msk.f32.gmra.mrb[16].mxu1 %vm285_vm0, %v621_v63  ;;  %1852 = vmatmul.mubr.msk.f32.gmra.mrb[16].mxu0 %vm285_vm0, %v624_v43 }
  0x6e   : > { %1774 = vmatprep.mubr.msk.f32.mxu1 %vm285_vm0, %v624_v43  ;;  %1854 = vmatprep.mubr.msk.f32.mxu0 %vm285_vm0, %v627_v44 }
  0x71   : > { %1775 = vmatmul.mubr.msk.f32.gmra.mrb[18].mxu1 %vm285_vm0, %v627_v44  ;;  %1855 = vmatmul.mubr.msk.f32.gmra.mrb[18].mxu0 %vm285_vm0, %v630_v9 }
  0x72   : > { %1777 = vmatprep.mubr.msk.f32.mxu1 %vm285_vm0, %v630_v9  ;;  %1857 = vmatprep.mubr.msk.f32.mxu0 %vm285_vm0, %v633_v30 }
  0x75   : > { %1778 = vmatmul.mubr.msk.f32.gmra.mrb[20].mxu1 %vm285_vm0, %v633_v30  ;;  %1858 = vmatmul.mubr.msk.f32.gmra.mrb[20].mxu0 %vm285_vm0, %v636_v12 }
  0x76   : > { %1780 = vmatprep.mubr.msk.f32.mxu1 %vm285_vm0, %v636_v12  ;;  %1860 = vmatprep.mubr.msk.f32.mxu0 %vm285_vm0, %v639_v14 }
  0x79   : > { %1781 = vmatmul.mubr.msk.f32.gmra.mrb[22].mxu1 %vm285_vm0, %v639_v14  ;;  %1861 = vmatmul.mubr.msk.f32.gmra.mrb[22].mxu0 %vm285_vm0, %v1132_v57 }
 0x120   : > { %v1749_v58 = vpop.f32.mrb[0].mxu1  ;;  %v1829_v2 = vpop.f32.mrb[0].mxu0 }
 0x121   : > { %v1879_v16 = vadd.f32 %v1829_v2, %v1749_v58  ;;  %v757_v17 = vpop.f32.mrb[1].mxu1  ;;  %v1208_v18 = vpop.f32.mrb[1].mxu0 }
 0x122   : > { %v1880_v21 = vadd.f32 %v1208_v18, %v757_v17 }
 0x123   : > { %v1359_v25 = vadd.f32 %v1879_v16, %v2477_v15 }
 0x124   : > { %v1358_v29 = vadd.f32 %v1880_v21, %v2477_v15  ;;  %v1752_v32 = vpop.f32.mrb[2].mxu1  ;;  %v1832_v33 = vpop.f32.mrb[2].mxu0 }
 0x125   : > { %1384 = vst.msk [vmem:[%s2481_s4 + $0x8] sm:$0xff] %vm1382_vm2, %v1359_v25  ;;  %v1881_v42 = vadd.f32 %v1832_v33, %v1752_v32  ;;  %v767_v34 = vpop.f32.mrb[3].mxu1  ;;  %v1218_v19 = vpop.f32.mrb[3].mxu0 }
 0x126   : > { %1383 = vst.msk [vmem:[%s2481_s4] sm:$0xff] %vm1382_vm2, %v1358_v29  ;;  %v1882_v20 = vadd.f32 %v1218_v19, %v767_v34 }
 0x127   : > { %v1361_v45 = vadd.f32 %v1881_v42, %v2477_v15 }
 0x128   : > { %v1360_v46 = vadd.f32 %v1882_v20, %v2477_v15  ;;  %v1755_v47 = vpop.f32.mrb[4].mxu1  ;;  %v1835_v50 = vpop.f32.mrb[4].mxu0 }
 0x129   : > { %1386 = vst.msk [vmem:[%s2481_s4 + $0x18] sm:$0xff] %vm1382_vm2, %v1361_v45  ;;  %v1883_v51 = vadd.f32 %v1835_v50, %v1755_v47  ;;  %v777_v52 = vpop.f32.mrb[5].mxu1  ;;  %v1228_v36 = vpop.f32.mrb[5].mxu0 }
 0x12a   : > { %1385 = vst.msk [vmem:[%s2481_s4 + $0x10] sm:$0xff] %vm1382_vm2, %v1360_v46  ;;  %v1884_v37 = vadd.f32 %v1228_v36, %v777_v52 }
 0x12b   : > { %v1363_v53 = vadd.f32 %v1883_v51, %v2477_v15 }
 0x12c   : > { %v1362_v54 = vadd.f32 %v1884_v37, %v2477_v15  ;;  %v1758_v56 = vpop.f32.mrb[6].mxu1  ;;  %v1838_v59 = vpop.f32.mrb[6].mxu0 }
 0x12d   : > { %1388 = vst.msk [vmem:[%s2481_s4 + $0x28] sm:$0xff] %vm1382_vm2, %v1363_v53  ;;  %v1885_v22 = vadd.f32 %v1838_v59, %v1758_v56  ;;  %v787_v23 = vpop.f32.mrb[7].mxu1  ;;  %v1238_v60 = vpop.f32.mrb[7].mxu0 }
 0x12e   : > { %1387 = vst.msk [vmem:[%s2481_s4 + $0x20] sm:$0xff] %vm1382_vm2, %v1362_v54  ;;  %v1886_v35 = vadd.f32 %v1238_v60, %v787_v23 }
 0x12f   : > { %v1365_v39 = vadd.f32 %v1885_v22, %v2477_v15 }
 0x130   : > { %v1364_v61 = vadd.f32 %v1886_v35, %v2477_v15  ;;  %v1761_v38 = vpop.f32.mrb[8].mxu1  ;;  %v1841_v40 = vpop.f32.mrb[8].mxu0 }
 0x131   : > { %1390 = vst.msk [vmem:[%s2481_s4 + $0x38] sm:$0xff] %vm1382_vm2, %v1365_v39  ;;  %v1887_v41 = vadd.f32 %v1841_v40, %v1761_v38  ;;  %v797_v62 = vpop.f32.mrb[9].mxu1  ;;  %v1248_v63 = vpop.f32.mrb[9].mxu0 }
 0x132   : > { %1389 = vst.msk [vmem:[%s2481_s4 + $0x30] sm:$0xff] %vm1382_vm2, %v1364_v61  ;;  %v1888_v0 = vadd.f32 %v1248_v63, %v797_v62 }
 0x133   : > { %v1367_v1 = vadd.f32 %v1887_v41, %v2477_v15 }
 0x134   : > { %v1366_v3 = vadd.f32 %v1888_v0, %v2477_v15  ;;  %v1764_v26 = vpop.f32.mrb[10].mxu1  ;;  %v1844_v24 = vpop.f32.mrb[10].mxu0 }
 0x135   : > { %1392 = vst.msk [vmem:[%s2481_s4 + $0x48] sm:$0xff] %vm1382_vm2, %v1367_v1  ;;  %v1889_v43 = vadd.f32 %v1844_v24, %v1764_v26  ;;  %v807_v27 = vpop.f32.mrb[11].mxu1  ;;  %v1258_v28 = vpop.f32.mrb[11].mxu0 }
 0x136   : > { %1391 = vst.msk [vmem:[%s2481_s4 + $0x40] sm:$0xff] %vm1382_vm2, %v1366_v3  ;;  %v1890_v4 = vadd.f32 %v1258_v28, %v807_v27 }
 0x137   : > { %v1369_v44 = vadd.f32 %v1889_v43, %v2477_v15 }
 0x138   : > { %v1368_v5 = vadd.f32 %v1890_v4, %v2477_v15  ;;  %v1767_v6 = vpop.f32.mrb[12].mxu1  ;;  %v1847_v7 = vpop.f32.mrb[12].mxu0 }
 0x139   : > { %1394 = vst.msk [vmem:[%s2481_s4 + $0x58] sm:$0xff] %vm1382_vm2, %v1369_v44  ;;  %v1891_v8 = vadd.f32 %v1847_v7, %v1767_v6  ;;  %v817_v9 = vpop.f32.mrb[13].mxu1  ;;  %v1268_v48 = vpop.f32.mrb[13].mxu0 }
 0x13a   : > { %1393 = vst.msk [vmem:[%s2481_s4 + $0x50] sm:$0xff] %vm1382_vm2, %v1368_v5  ;;  %v1892_v10 = vadd.f32 %v1268_v48, %v817_v9 }
 0x13b   : > { %v1371_v11 = vadd.f32 %v1891_v8, %v2477_v15 }
 0x13c   : > { %v1370_v30 = vadd.f32 %v1892_v10, %v2477_v15  ;;  %v1770_v49 = vpop.f32.mrb[14].mxu1  ;;  %v1850_v31 = vpop.f32.mrb[14].mxu0 }
 0x13d   : > { %1396 = vst.msk [vmem:[%s2481_s4 + $0x68] sm:$0xff] %vm1382_vm2, %v1371_v11  ;;  %v1893_v12 = vadd.f32 %v1850_v31, %v1770_v49  ;;  %v827_v55 = vpop.f32.mrb[15].mxu1  ;;  %v1278_v13 = vpop.f32.mrb[15].mxu0 }
 0x13e   : > { %1395 = vst.msk [vmem:[%s2481_s4 + $0x60] sm:$0xff] %vm1382_vm2, %v1370_v30  ;;  %v1894_v14 = vadd.f32 %v1278_v13, %v827_v55 }
 0x13f   : > { %v1373_v57 = vadd.f32 %v1893_v12, %v2477_v15 }
 0x140   : > { %v1372_v58 = vadd.f32 %v1894_v14, %v2477_v15  ;;  %v1773_v2 = vpop.f32.mrb[16].mxu1  ;;  %v1853_v16 = vpop.f32.mrb[16].mxu0 }
 0x141   : > { %1398 = vst.msk [vmem:[%s2481_s4 + $0x78] sm:$0xff] %vm1382_vm2, %v1373_v57  ;;  %v1895_v17 = vadd.f32 %v1853_v16, %v1773_v2  ;;  %v837_v18 = vpop.f32.mrb[17].mxu1  ;;  %v1288_v21 = vpop.f32.mrb[17].mxu0 }
 0x142   : > { %1397 = vst.msk [vmem:[%s2481_s4 + $0x70] sm:$0xff] %vm1382_vm2, %v1372_v58  ;;  %v1896_v25 = vadd.f32 %v1288_v21, %v837_v18 }
 0x143   : > { %v1375_v29 = vadd.f32 %v1895_v17, %v2477_v15 }
 0x144   : > { %v1374_v32 = vadd.f32 %v1896_v25, %v2477_v15  ;;  %v1776_v33 = vpop.f32.mrb[18].mxu1  ;;  %v1856_v42 = vpop.f32.mrb[18].mxu0 }
 0x145   : > { %1400 = vst.msk [vmem:[%s2481_s4 + $0x88] sm:$0xff] %vm1382_vm2, %v1375_v29  ;;  %v1897_v34 = vadd.f32 %v1856_v42, %v1776_v33  ;;  %v847_v19 = vpop.f32.mrb[19].mxu1  ;;  %v1298_v20 = vpop.f32.mrb[19].mxu0 }
 0x146   : > { %1399 = vst.msk [vmem:[%s2481_s4 + $0x80] sm:$0xff] %vm1382_vm2, %v1374_v32  ;;  %v1898_v45 = vadd.f32 %v1298_v20, %v847_v19 }
 0x147   : > { %v1377_v46 = vadd.f32 %v1897_v34, %v2477_v15 }
 0x148   : > { %v1376_v47 = vadd.f32 %v1898_v45, %v2477_v15  ;;  %v1779_v50 = vpop.f32.mrb[20].mxu1  ;;  %v1859_v51 = vpop.f32.mrb[20].mxu0 }
 0x149   : > { %1402 = vst.msk [vmem:[%s2481_s4 + $0x98] sm:$0xff] %vm1382_vm2, %v1377_v46  ;;  %v1899_v52 = vadd.f32 %v1859_v51, %v1779_v50  ;;  %v857_v36 = vpop.f32.mrb[21].mxu1  ;;  %v1308_v37 = vpop.f32.mrb[21].mxu0 }
 0x14a   : > { %1401 = vst.msk [vmem:[%s2481_s4 + $0x90] sm:$0xff] %vm1382_vm2, %v1376_v47  ;;  %v1900_v53 = vadd.f32 %v1308_v37, %v857_v36 }
 0x14b   : > { %v1379_v54 = vadd.f32 %v1899_v52, %v2477_v15 }
 0x14c   : > { %v1378_v56 = vadd.f32 %v1900_v53, %v2477_v15  ;;  %v1782_v59 = vpop.f32.mrb[22].mxu1  ;;  %v1862_v22 = vpop.f32.mrb[22].mxu0 }
 0x14d   : > { %1404 = vst.msk [vmem:[%s2481_s4 + $0xa8] sm:$0xff] %vm1382_vm2, %v1379_v54  ;;  %v1901_v23 = vadd.f32 %v1862_v22, %v1782_v59  ;;  %v867_v60 = vpop.f32.mrb[23].mxu1  ;;  %v1318_v35 = vpop.f32.mrb[23].mxu0 }
 0x14e   : > { %1403 = vst.msk [vmem:[%s2481_s4 + $0xa0] sm:$0xff] %vm1382_vm2, %v1378_v56  ;;  %v1902_v39 = vadd.f32 %v1318_v35, %v867_v60 }
 0x14f   : > { %v1381_v61 = vadd.f32 %v1901_v23, %v2477_v15 }
 0x150   : > { %v1380_v38 = vadd.f32 %v1902_v39, %v2477_v15 }
 0x151   : > { %1406 = vst.msk [vmem:[%s2481_s4 + $0xb8] sm:$0xff] %vm1382_vm2, %v1381_v61 }
 0x152   : > { %1405 = vst.msk [vmem:[%s2481_s4 + $0xb0] sm:$0xff] %vm1382_vm2, %v1380_v38 }
 0x153   : > { %2007 = shalt.err (!%p2004_p3)
}
 0x154   : > { %s2008_s20 = scalar_lea.hbm %s2553_s8, 3072  ;;  %s2012_s26 = scalar_lea.hbm %s2608_s3, 6144 }
 0x155   : > { %p2009_p4 = scmp.ne.s32.totalorder %s2553_s8, %s2008_s20  ;;  %p2013_p9 = scmp.lt.u32.totalorder %s2553_s8, %s2608_s3 }
 0x156   : > { %p2014_p10 = scmp.lt.u32.totalorder %s2012_s26, %s2008_s20  ;;  %p2016_p12 = scmp.lt.u32.totalorder %s2008_s20, %s2553_s8 }
 0x157   : > { %p2010_p7 = pnand %p2009_p4, %p2119_p5 }
 0x158   : > { %p2015_p11 = por %p2014_p10, %p2013_p9 }
 0x159   : > { %p2011_p8 = pneg %p2010_p7 }
 0x15a   : > { %p2017_p13 = por %p2016_p12, %p2015_p11 }
 0x15c   : > { %p2018_p0 = pnand %p2017_p13, %p2011_p8 }
 0x15e   : > { %2021 = shalt.err (!%p2018_p0)
}
 0x15f   : > { %s2059_s29 = smov 128   ;;  %s2060_s30 = smov 8  }
 0x160   : > { %1953 = dma.vmem_to_hbm [thread:$0]  (%p2119_p5), %s2555_s6, 3072, %s2553_s8, %s2564_s9, %s2059_s29, %s2059_s29, %s2060_s30  }
 0x161 PF: > { %p1959_p1 = scmp.ge.s32.totalorder %s2056_s15, 2  ;;  %s1437_s4 = sand.u32 1, %s2044_s12  }
 0x162   : > { %s1438_s5 = scalar_lea.sflag [#allocation3], %s1437_s4 }
 0x163   : > { %p1956_p2 = pnand %p1959_p1, %p2123_p6 }
 0x165   : > { %2039 = dma.done.wait (!%p1956_p2), %s1438_s5, 3072  }
 0x166   : > { %2041 = vsyncadd (!%p1956_p2), %s1438_s5, 4294964224  ;;  %p13_p3 = scmp.ge.s32.totalorder %s2106_s18, 4   ;;  %s2611_s12 = smov %s2048_s13 }
 0x167   : > { %s2612_s13 = smov %s2052_s14  ;;  %s2613_s14 = smov %s2117_s21 }
 0x168   : > { %s2614_s15 = smov %s2106_s18  ;;  %15 = sbr.rel (!%p13_p3) target bundleno = 3 (0x3), region = 70 }
 0x16f   :  { %1443 = vsyncpa [#allocation3], 1 }
 0x170   :  { %1445 = vsyncpa [#allocation3 + $0x1], 1 }

</bundles_post_ra>
